<compile_context>
chip_gen: v5e
topology: v5e:2x2
jax: 0.10.0
libtpu: 0.0.40
codegen_flags: <defaults>
</compile_context>

<pallas_src>
import functools

import jax
import jax.numpy as jnp
from jax.experimental import pallas as pl
from jax.experimental.pallas import tpu as pltpu


def _round_up(a: int, b: int) -> int:
    return (a + b - 1) // b * b


def _sublane_multiple(dtype) -> int:
    # f32 -> 8, bf16/f16 -> 16, int8/fp8 -> 32 (sub-32-bit dtypes pack along sublanes).
    return max(8, 32 // jnp.dtype(dtype).itemsize)


def _vmem_capacity_bytes() -> int:
    # Generation-aware VMEM capacity (128 MiB on v5e/v6e, 64 MiB per TC on v7x).
    # Narrow guard only around the hardware-info query (not around the kernel).
    try:
        return int(pltpu.get_tpu_info().vmem_capacity_bytes)
    except Exception:
        return 64 << 20  # conservative fallback (v7x per-TC)


def get_expk(N, dtype=jnp.float32):
    """Mirror of discrete_spectral_transform.get_expk: [N, 2] with
    [2*cos(pi*k/(2N)), 2*sin(pi*k/(2N))].  Kept for API fidelity; the Pallas
    kernel derives the sine basis directly."""
    k = jnp.arange(N, dtype=jnp.float32) * (jnp.pi / (2.0 * N))
    return jnp.stack([2.0 * jnp.cos(k), 2.0 * jnp.sin(k)], axis=-1).astype(dtype)


def _sine_basis(N: int, rows: int, cols: int, dtype):
    """S[n, k] = sin(pi*n*(2k+1)/(2N)), zero-padded to (rows, cols).

    Always built in float32 (bf16 angle is badly quantized for N > ~128),
    cast to the compute dtype at the end."""
    n = jnp.arange(N, dtype=jnp.float32)[:, None]   # input index (rows)
    k = jnp.arange(N, dtype=jnp.float32)[None, :]   # output index (cols)
    S = jnp.sin((jnp.pi / (2.0 * N)) * n * (2.0 * k + 1.0))
    if rows != N or cols != N:
        S = jnp.pad(S, ((0, rows - N), (0, cols - N)))
    return S.astype(dtype)


# ------------------------------- kernels -------------------------------------

def _idxst_kernel_resident(x_ref, s_ref, o_ref, *, op_dtype):
    # One MXU matmul per row tile against the full (VMEM-resident) sine basis.
    # The optional compute_dtype cast is done per block, inside the kernel.
    x = x_ref[...]
    if x.dtype != op_dtype:
        x = x.astype(op_dtype)
    o_ref[...] = jnp.dot(
        x, s_ref[...], preferred_element_type=jnp.float32
    ).astype(o_ref.dtype)


def _idxst_kernel_tiled(x_ref, s_ref, o_ref, acc_ref, *, op_dtype):
    # 3-D grid (rows, out-cols, contraction); accumulate in f32 scratch (P3).
    @pl.when(pl.program_id(2) == 0)
    def _():
        acc_ref[...] = jnp.zeros_like(acc_ref)

    x = x_ref[...]
    if x.dtype != op_dtype:
        x = x.astype(op_dtype)
    acc_ref[...] += jnp.dot(x, s_ref[...], preferred_element_type=jnp.float32)

    @pl.when(pl.program_id(2) == pl.num_programs(2) - 1)
    def _():
        o_ref[...] = acc_ref[...].astype(o_ref.dtype)


# ------------------------------- wrapper --------------------------------------

def idxst(x, expk=None, *, compute_dtype=None, resident_n_max=None,
          tm=None, tn=512, tk=512):
    """IDXST along the last axis of x via a Pallas TPU kernel.

    compute_dtype: optionally cast the matmul operands inside the kernel
    (e.g. jnp.bfloat16 on v6e/v7x for ~3-8x MXU throughput on the large-N
    path); accumulation stays f32 and the output keeps x.dtype.  Default keeps
    full input precision.
    resident_n_max: optional cap on N for the VMEM-resident-basis path (None =
    decide purely from the VMEM budget).  Set 0 to force the tiled path.
    """
    # TODO(synk): expk (DREAMPlace factor-2 convention) is accepted for API
    # parity but the kernel derives the sine basis directly from the docstring
    # formula; validate scale/normalization against dct_cpp.idxst if bit-exact
    # parity with DREAMPlace's FFT recomposition is required.
    # TODO(synk): for very large N an O(N log N) FFT recomposition would beat
    # this dense O(N^2) matmul; the tiled path only keeps it VMEM-safe.
    del expk

    orig_shape = x.shape
    N = orig_shape[-1]
    out_dtype = x.dtype
    op_dtype = jnp.dtype(out_dtype if compute_dtype is None else compute_dtype)

    x2 = x.reshape(-1, N)
    M = x2.shape[0]

    in_bytes = jnp.dtype(x.dtype).itemsize
    op_bytes = op_dtype.itemsize
    out_bytes = jnp.dtype(out_dtype).itemsize
    sub = _sublane_multiple(x.dtype)

    N_pad = _round_up(N, 128)                      # lane-dense output stores
    vmem_cap = _vmem_capacity_bytes()
    vmem_budget = max(32 << 20, vmem_cap - (24 << 20))

    def _vmem_limit(need):
        return int(min(max(need + (4 << 20), 32 << 20), vmem_cap - (8 << 20)))

    # -------- resident plan: full sine basis in VMEM, one matmul per row tile --
    def _resident_plan():
        s_bytes = 2 * N * N_pad * op_bytes         # double-buffered basis
        # ~2 MiB input row blocks (>=256 rows, <=1024), rounded to sublane mult.
        t = min(max(256, (2 << 20) // max(1, N * in_bytes)), 1024)
        t = min(_round_up(t, sub), _round_up(M, sub))
        # Keep >=2 parallel grid steps when possible (dual-TC on v7x).
        if M > 2 * sub and pl.cdiv(M, t) < 2:
            t = _round_up(pl.cdiv(M, 2), sub)
        if tm is not None:
            t = min(max(sub, _round_up(tm, sub)), _round_up(M, sub))
        while True:
            need = s_bytes + 2 * t * (N * in_bytes + N_pad * out_bytes)
            if need + (4 << 20) <= vmem_budget:
                return t, need
            if t <= max(sub, 64):
                return None, None
            t = max(sub, _round_up(t // 2, sub))

    res_tm, res_need = _resident_plan()
    use_resident = res_tm is not None and (resident_n_max is None
                                           or N <= resident_n_max)

    if use_resident:
        # x keeps its native dtype and exact (M, N) shape: no pad/cast HBM pass.
        S = _sine_basis(N, N, N_pad, op_dtype)      # (N, N_pad): exact contraction
        grid = (pl.cdiv(M, res_tm),)
        cost = pl.CostEstimate(
            flops=2 * M * N * N_pad,
            transcendentals=0,
            bytes_accessed=(in_bytes * M * N + op_bytes * N * N_pad
                            + out_bytes * M * N_pad),
        )
        out = pl.pallas_call(
            functools.partial(_idxst_kernel_resident, op_dtype=op_dtype),
            out_shape=jax.ShapeDtypeStruct((M, N_pad), out_dtype),
            grid_spec=pltpu.PrefetchScalarGridSpec(
                num_scalar_prefetch=0,
                grid=grid,
                in_specs=[
                    pl.BlockSpec((res_tm, N), lambda i: (i, 0)),
                    # constant index_map -> basis DMA'd from HBM exactly once
                    pl.BlockSpec((N, N_pad), lambda i: (0, 0)),
                ],
                out_specs=pl.BlockSpec((res_tm, N_pad), lambda i: (i, 0)),
            ),
            compiler_params=pltpu.CompilerParams(
                dimension_semantics=("parallel",),
                vmem_limit_bytes=_vmem_limit(res_need),
            ),
            cost_estimate=cost,
        )(x2, S)
    else:
        # Tiled path for basis too large to keep resident.  tn/tk are multiples
        # of 128 that divide N_pad (bounded padding waste; zero-safe contraction).
        def _pick(req):
            c = max(128, _round_up(req, 128))
            while c > 128 and N_pad % c != 0:
                c -= 128
            return c if N_pad % c == 0 else 128

        tn_t = _pick(tn)
        tk_t = _pick(tk)
        tm_t = min(_round_up(tm if tm is not None else 512, sub),
                   _round_up(M, sub))

        if N_pad != N:
            # Contraction columns must be zero (garbage would corrupt every
            # output column); only the row dimension is safe to leave ragged.
            x2 = jnp.pad(x2, ((0, 0), (0, N_pad - N)))
        S = _sine_basis(N, N_pad, N_pad, op_dtype)

        row_tiles = pl.cdiv(M, tm_t)
        col_tiles = N_pad // tn_t
        need = (2 * (tm_t * tk_t * in_bytes + tk_t * tn_t * op_bytes
                     + tm_t * tn_t * out_bytes) + 4 * tm_t * tn_t)
        cost = pl.CostEstimate(
            flops=2 * M * N_pad * N_pad,
            transcendentals=0,
            # Model the actual re-streaming: x once per output-column tile,
            # the basis once per row tile.
            bytes_accessed=(in_bytes * col_tiles * M * N_pad
                            + op_bytes * row_tiles * N_pad * N_pad
                            + out_bytes * M * N_pad),
        )
        out = pl.pallas_call(
            functools.partial(_idxst_kernel_tiled, op_dtype=op_dtype),
            out_shape=jax.ShapeDtypeStruct((M, N_pad), out_dtype),
            grid_spec=pltpu.PrefetchScalarGridSpec(
                num_scalar_prefetch=0,
                grid=(row_tiles, col_tiles, N_pad // tk_t),
                in_specs=[
                    pl.BlockSpec((tm_t, tk_t), lambda i, j, k: (i, k)),
                    pl.BlockSpec((tk_t, tn_t), lambda i, j, k: (k, j)),
                ],
                out_specs=pl.BlockSpec((tm_t, tn_t), lambda i, j, k: (i, j)),
                scratch_shapes=[pltpu.VMEM((tm_t, tn_t), jnp.float32)],
            ),
            compiler_params=pltpu.CompilerParams(
                dimension_semantics=("parallel", "parallel", "arbitrary"),
                vmem_limit_bytes=_vmem_limit(need),
            ),
            cost_estimate=cost,
        )(x2, S)

    if N_pad != N:
        out = out[:, :N]
    return out.reshape(orig_shape)


class IDXST:
    """JAX mirror of the PyTorch IDXST module (forward only)."""

    def __init__(self, expk=None):
        self.expk = expk

    def __call__(self, x):
        N = x.shape[-1]
        if self.expk is None or self.expk.shape[-2] != N:
            self.expk = get_expk(N, dtype=x.dtype)
        return idxst(x, self.expk)


if __name__ == "__main__":
    key = jax.random.PRNGKey(0)
    k1, k2 = jax.random.split(key)

    def reference(x):
        N = x.shape[-1]
        n = jnp.arange(N, dtype=jnp.float32)[:, None]
        k = jnp.arange(N, dtype=jnp.float32)[None, :]
        S_ref = jnp.sin((jnp.pi / (2.0 * N)) * n * (2.0 * k + 1.0))
        return jnp.einsum("...n,nk->...k", x.astype(jnp.float32),
                          S_ref).astype(x.dtype)

    mod = IDXST()

    # Small N (< 128 lanes): resident path, lane-padded output columns only.
    x1 = jax.random.normal(k1, (2, 4, 16, 16), dtype=jnp.float32)
    y1 = jax.block_until_ready(mod(x1))
    assert y1.shape == x1.shape and y1.dtype == x1.dtype
    assert jnp.allclose(y1, reference(x1), atol=1e-4, rtol=1e-4), "mismatch (x1)"

    # Ragged M (4*100 = 400 rows -> ragged edge row block, no M padding).
    x2 = jax.random.normal(k2, (4, 100, 64), dtype=jnp.float32)
    y2 = jax.block_until_ready(idxst(x2))
    assert y2.shape == x2.shape and y2.dtype == x2.dtype
    assert jnp.allclose(y2, reference(x2), atol=1e-4, rtol=1e-4), "mismatch (x2)"

    # Force the tiled (large-N) path on the same small problem to validate it.
    y3 = jax.block_until_ready(idxst(x2, resident_n_max=0))
    assert jnp.allclose(y3, reference(x2), atol=1e-4, rtol=1e-4), "mismatch (tiled)"

    print("KERNEL_OK")
</pallas_src>

<mosaic_0001>
module attributes {stable_mosaic.version = 11 : i64} {
  func.func @_idxst_kernel_resident(%arg0: i32, %arg1: memref<64x16xf32, #tpu.memory_space<vmem>>, %arg2: memref<16x128xf32, #tpu.memory_space<vmem>>, %arg3: memref<64x128xf32, #tpu.memory_space<vmem>>) attributes {dimension_semantics = [#tpu.dimension_semantics<parallel>], iteration_bounds = array<i64: 2>, scalar_prefetch = 0 : i64, scratch_operands = 0 : i64, tpu.core_type = #tpu.core_type<tc>, window_params = [{transform_indices = @transform_0, window_bounds = array<i64: 64, 16>}, {pipeline_mode = #tpu.pipeline_mode<synchronous>, transform_indices = @transform_1, window_bounds = array<i64: 16, 128>}, {transform_indices = @transform_2, window_bounds = array<i64: 64, 128>}]} {
    %c0 = arith.constant 0 : index
    %c0_0 = arith.constant 0 : index
    %0 = vector.load %arg1[%c0, %c0_0] : memref<64x16xf32, #tpu.memory_space<vmem>>, vector<64x16xf32>
    %c0_1 = arith.constant 0 : index
    %c0_2 = arith.constant 0 : index
    %1 = vector.load %arg2[%c0_1, %c0_2] : memref<16x128xf32, #tpu.memory_space<vmem>>, vector<16x128xf32>
    %cst = arith.constant dense<0.000000e+00> : vector<64x128xf32>
    %2 = tpu.matmul %0, %1, %cst {dimension_numbers = #tpu.dot_dimension_numbers<[1], [0], [0], [1], [0, 0, 1, 1], [], []>} : vector<64x16xf32>, vector<16x128xf32>, vector<64x128xf32> -> vector<64x128xf32>
    %c0_3 = arith.constant 0 : index
    %c0_4 = arith.constant 0 : index
    %3 = vector.load %arg3[%c0_3, %c0_4] : memref<64x128xf32, #tpu.memory_space<vmem>>, vector<64x128xf32>
    tpu.vector_store %arg3[%c0_3, %c0_4], %2 {strides = array<i32>} : memref<64x128xf32, #tpu.memory_space<vmem>>, vector<64x128xf32>,
    return
  }
  func.func @transform_0(%arg0: i32) -> (i32, i32) {
    %c0_i32 = arith.constant 0 : i32
    %c0_i32_0 = arith.constant 0 : i32
    return %arg0, %c0_i32 : i32, i32
  }
  func.func @transform_1(%arg0: i32) -> (i32, i32) {
    %c0_i32 = arith.constant 0 : i32
    %c0_i32_0 = arith.constant 0 : i32
    %c0_i32_1 = arith.constant 0 : i32
    return %c0_i32, %c0_i32_0 : i32, i32
  }
  func.func @transform_2(%arg0: i32) -> (i32, i32) {
    %c0_i32 = arith.constant 0 : i32
    %c0_i32_0 = arith.constant 0 : i32
    return %arg0, %c0_i32 : i32, i32
  }
}

</mosaic_0001>

<bundles_post_ra>
// kernel: tpu_custom_call.1
= control target key start
LH: loop header
LB: loop body
LE: loop exit
PB: predicated region body
PF: predicated region fallthrough
CT: control target
= control target key end

     0   :  { %7 = vsyncpa [#allocation3], 0  ;;  %s554_s0 = inlined_call_operand.vmem [shape: f32[128,16], index: 0, kind: input, shape index: {}]   ;;  %s555_s1 = inlined_call_operand.vmem [shape: f32[16,128], index: 1, kind: input, shape index: {}]   ;;  %s556_s2 = inlined_call_operand.hbm [shape: f32[128,128], index: 2, kind: output, shape index: {}]  }
   0x1   :  { %9 = vsyncpa [#allocation3 + $0x1], 0  ;;  %s456_s9 = smov 0   ;;  %s458_s10 = smov 0  }
   0x2   :  { %s460_s11 = smov 0   ;;  %s462_s12 = smov 0  }
   0x3 LB: > { %s477_s13 = sadd.s32 4294967295, %s437_s12   ;;  %s307_s14 = sadd.s32 4294967294, %s437_s12   ;;  %s437_s12 = sphi %s462_s12, %s562_s12   ;;  %s433_s11 = sphi %s460_s11, %s561_s11   ;;  %s429_s10 = sphi %s458_s10, %s560_s10   ;;  %s425_s9 = sphi %s456_s9, %s559_s9  }
   0x4   : > { %s481_s15 = sadd.s32 1, %s437_s12   ;;  %s69_s16 = sadd.s32 1, %s433_s11 }
   0x5   : > { %s66_s17 = ssub.s32 %s437_s12, %s481_s15  ;;  %p79_p0 = scmp.ne.s32.totalorder %s433_s11, %s429_s10 }
   0x6   : > { %p67_p1 = scmp.eq.s32.totalorder %s66_s17, 0  ;;  %p80_p2 = scmp.eq.s32.totalorder %s477_s13, 1 }
   0x7   : > { %p85_p3 = scmp.ne.s32.totalorder %s429_s10, %s425_s9  ;;  %p86_p4 = scmp.eq.s32.totalorder %s307_s14, 1 }
   0x8   : > { %s492_s18 = scalar_select %p67_p1, %s433_s11, %s69_s16  }
   0x9   : > { %p494_p5 = por %p80_p2, %p79_p0  ;;  %p498_p6 = por %p86_p4, %p85_p3 }
   0xa   : > { %p310_p7 = scmp.ge.s32.totalorder %s437_s12, 1  ;;  %p116_p8 = scmp.lt.s32.totalorder %s437_s12, 3 }
   0xc   : > { %p117_p9 = pnand %p310_p7, %p116_p8 }
   0xd   : > { %s312_s25 = sshll.u32 (!%p117_p9), %s477_s13, 3  ;;  %s135_s30 = sand.u32 (!%p117_p9), 1, %s429_s10  }
   0xe   : > { %120 = sbr.rel (%p117_p9) target bundleno = 169 (0xa9), region = 28  ;;  %p139_p10 = scmp.lt.s32.totalorder (!%p117_p9), %s312_s25, 15 }
   0xf   : > { %s311_s3 = sshll.u32 (!%p117_p9), %s135_s30, 6  ;;  %s327_s5 = sshll.u32 (!%p117_p9), %s477_s13, 6 }
  0x10   : > { %s137_s4 = scalar_lea.vmem (!%p117_p9), [#allocation2], %s311_s3  ;;  %s241_s8 = scalar_lea.hbm (!%p117_p9), %s556_s2, %s327_s5 }
  0x11   : > { %s242_s14 = sshll.u32 (!%p117_p9), %s137_s4, 4  ;;  %s244_s16 = sshll.u32 (!%p117_p9), %s241_s8, 4  ;;  %s243_s14 = int_to_ptr.vmem [resolvable:$true] %s242_s14  ;;  %s245_s16 = int_to_ptr.hbm [resolvable:$true] %s244_s16 }
  0x12   : > { %s230_s13 = scalar_lea.sflag (!%p117_p9), [#allocation3], %s135_s30  ;;  %s389_s17 = sshra.s32 (!%p117_p9), %s245_s16, 4  ;;  %s390_s17 = int_to_ptr.hbm [resolvable:$true] %s389_s17 }
  0x13   : > { %v154_v0 = vld [vmem:[%s555_s1 + $0x8] sm:$0xff]  ;;  %v153_v1 = vld [vmem:[%s555_s1] sm:$0xff]  ;;  %s564_s25 = smov (!%p139_p10, %s312_s25), 15  ;;  %vm155_vm0 = vcmask 130048   ;;  %s391_s21 = scalar_lea.hbm %s390_s17, 64 }
  0x14   : > { %329 = vmatpush.msra.mxu2 %v154_v0  ;;  %330 = vmatpush.msra.mxu3 %v154_v0  ;;  %s313_s26 = sshll.u32 %s564_s25, 3  ;;  %p392_p11 = scmp.ne.s32.totalorder %s390_s17, %s391_s21 }
  0x15   : > { %194 = vmatpush.msra.mxu0 %v154_v0  ;;  %328 = vmatpush.msra.mxu1 %v154_v0  ;;  %s142_s29 = scalar_lea.vmem %s554_s0, %s313_s26  ;;  %s395_s24 = scalar_lea.hbm %s556_s2, 128 }
  0x16   : > { %332 = vmatpush.msra.mxu2 %v153_v1  ;;  %333 = vmatpush.msra.mxu3 %v153_v1  ;;  %v149_v2 = vld [vmem:[%s142_s29 + $0x20] sm:$0xff]  ;;  %v151_v3 = vld [vmem:[%s142_s29 + $0x30] sm:$0xff]  ;;  %v150_v6 = vld [vmem:[%s142_s29 + $0x28] sm:$0xff]  ;;  %p393_p12 = pnand %p392_p11, %p494_p5  ;;  %p396_p0 = scmp.lt.s32.totalorder %s390_s17, %s556_s2 }
  0x17   : > { %195 = vmatpush.msra.mxu0 %v153_v1  ;;  %331 = vmatpush.msra.mxu1 %v153_v1  ;;  %v145_v4 = vld [vmem:[%s142_s29] sm:$0xff]  ;;  %v147_v5 = vld [vmem:[%s142_s29 + $0x10] sm:$0xff]  ;;  %v152_v7 = vld [vmem:[%s142_s29 + $0x38] sm:$0xff]  ;;  %p397_p1 = scmp.lt.s32.totalorder %s395_s24, %s391_s21 }
  0x18   : > { %318 = vmatmul.msk.f32.vlgmr.msra.gmra.mxu2 %vm155_vm0, %v149_v2  ;;  %320 = vmatmul.msk.f32.vlgmr.msra.gmra.mxu3 %vm155_vm0, %v151_v3  ;;  %v146_v8 = vld [vmem:[%s142_s29 + $0x8] sm:$0xff]  ;;  %v148_v9 = vld [vmem:[%s142_s29 + $0x18] sm:$0xff]  ;;  %p394_p13 = pneg %p393_p12 }
  0x19   : > { %314 = vmatmul.msk.f32.vlgmr.msra.gmra.mxu0 %vm155_vm0, %v145_v4  ;;  %316 = vmatmul.msk.f32.vlgmr.msra.gmra.mxu1 %vm155_vm0, %v147_v5  ;;  %p398_p2 = por %p397_p1, %p396_p0 }
  0x1b   : > { %p399_p3 = pnand %p398_p2, %p394_p13 }
  0x20   : > { %319 = vmatmul.msk.f32.gmra.mxu2 %vm155_vm0, %v150_v6  ;;  %321 = vmatmul.msk.f32.gmra.mxu3 %vm155_vm0, %v152_v7 }
  0x21   : > { %315 = vmatmul.msk.f32.gmra.mxu0 %vm155_vm0, %v146_v8  ;;  %317 = vmatmul.msk.f32.gmra.mxu1 %vm155_vm0, %v148_v9 }
  0x96   : > { %v197_v10 = vpop.f32.mrf.mxu0  ;;  %v203_v11 = vpop.f32.mrf.mxu1 }
  0x97   : > { %221 = vst [vmem:[%s137_s4] sm:$0xff] %v197_v10 }
  0x98   : > { %223 = vst [vmem:[%s137_s4 + $0x10] sm:$0xff] %v203_v11 }
  0x9b   : > { %v209_v12 = vpop.f32.mrf.mxu2  ;;  %v215_v13 = vpop.f32.mrf.mxu3 }
  0x9c   : > { %225 = vst [vmem:[%s137_s4 + $0x20] sm:$0xff] %v209_v12 }
  0x9d   : > { %227 = vst [vmem:[%s137_s4 + $0x30] sm:$0xff] %v215_v13 }
  0x9e   : > { %v200_v14 = vpop.f32.mrf.mxu0  ;;  %v206_v15 = vpop.f32.mrf.mxu1 }
  0x9f   : > { %222 = vst [vmem:[%s137_s4 + $0x8] sm:$0xff] %v200_v14 }
  0xa0   : > { %224 = vst [vmem:[%s137_s4 + $0x18] sm:$0xff] %v206_v15 }
  0xa3   : > { %v212_v16 = vpop.f32.mrf.mxu2  ;;  %v218_v17 = vpop.f32.mrf.mxu3 }
  0xa4   : > { %226 = vst [vmem:[%s137_s4 + $0x28] sm:$0xff] %v212_v16 }
  0xa5   : > { %228 = vst [vmem:[%s137_s4 + $0x38] sm:$0xff] %v218_v17 }
  0xa6   : > { %402 = shalt.err (!%p399_p3)
}
  0xa7   : > { %s439_s27 = smov 128   ;;  %s440_s28 = smov 8  }
  0xa8   : > { %334 = dma.vmem_to_hbm [thread:$0]  (%p494_p5), %s243_s14, 1024, %s245_s16, %s230_s13, %s439_s27, %s439_s27, %s440_s28  }
  0xa9 PF: > { %p340_p4 = scmp.ge.s32.totalorder %s437_s12, 2  ;;  %s259_s29 = sand.u32 1, %s425_s9  }
  0xaa   : > { %s260_s30 = scalar_lea.sflag [#allocation3], %s259_s29 }
  0xab   : > { %p337_p7 = pnand %p340_p4, %p498_p6 }
  0xad   : > { %p338_p8 = pneg %p337_p7 }
  0xaf   : > { %420 = dma.done.wait (%p338_p8), %s260_s30, 1024  }
  0xb0   : > { %422 = vsyncadd (%p338_p8), %s260_s30, 4294966272  ;;  %p12_p9 = scmp.ge.s32.totalorder %s481_s15, 4   ;;  %s559_s9 = smov %s429_s10 }
  0xb1   : > { %s560_s10 = smov %s433_s11  ;;  %s561_s11 = smov %s492_s18 }
  0xb2   : > { %s562_s12 = smov %s481_s15  ;;  %14 = sbr.rel (!%p12_p9) target bundleno = 3 (0x3), region = 63 }
  0xb7   :  { %266 = vsyncpa [#allocation3], 1 }
  0xb8   :  { %268 = vsyncpa [#allocation3 + $0x1], 1 }

</bundles_post_ra>
